<compile_context>
chip_gen: v7x
topology: tpu7x:2x2x1
jax: 0.10.0
libtpu: 0.0.40
codegen_flags: <defaults>
</compile_context>

<pallas_src>
import jax
import jax.numpy as jnp
from jax.experimental import pallas as pl
from jax.experimental.pallas import tpu as pltpu


def _round_up(x: int, m: int) -> int:
    return pl.cdiv(x, m) * m


def prepare_feature_predictor_params(w1, b1, w2, b2, *, use_bf16=False):
    """One-time (init-time) padding / casting of the MLP parameters.

    Weights are stored pre-transposed as (in_features, out_features) so the
    kernel computes plain `h @ W + b`.  Only the lane (output) dims are
    zero-padded to multiples of 128 -- exact, since padded weight columns /
    rows and bias entries are zero.  Biases stay f32 (f32 epilogue).
    """
    H = w1.shape[0]
    O = w2.shape[1]
    Hp = _round_up(H, 128)
    Op = _round_up(O, 128)
    w_dtype = jnp.bfloat16 if use_bf16 else w1.dtype

    w1_p = jnp.zeros((H, Hp), w_dtype).at[:, :H].set(w1.astype(w_dtype))
    b1_p = jnp.zeros((1, Hp), jnp.float32).at[0, :H].set(b1.astype(jnp.float32))
    w2_p = jnp.zeros((Hp, Op), w_dtype).at[:H, :O].set(w2.astype(w_dtype))
    b2_p = jnp.zeros((1, Op), jnp.float32).at[0, :O].set(b2.astype(jnp.float32))
    return w1_p, b1_p, w2_p, b2_p


def feature_predictor_kernel(h_ref, w1_ref, b1_ref, w2_ref, b2_ref, o_ref):
    """Fused fc1 -> LeakyReLU -> fc2 on one (TB, H) batch tile."""
    # fc1 on the MXU, f32 accumulation.
    z1 = jnp.dot(h_ref[...], w1_ref[...], preferred_element_type=jnp.float32)
    z1 = z1 + b1_ref[...]                       # f32 bias add

    # LeakyReLU (negative_slope=0.01, matching nn.LeakyReLU()); f32 epilogue.
    a1 = jnp.where(z1 >= 0, z1, 0.01 * z1)

    # fc2: cast the per-tile activation to the weight dtype (no-op in f32).
    z2 = jnp.dot(a1.astype(w2_ref.dtype), w2_ref[...],
                 preferred_element_type=jnp.float32)
    o_ref[...] = (z2 + b2_ref[...]).astype(o_ref.dtype)


def feature_predictor(h, w1_p, b1_p, w2_p, b2_p, *, tb=1024,
                      out_features=None, out_dtype=None,
                      single_buffer_weights=True):
    """h: (B, H); padded params from prepare_feature_predictor_params()."""
    B, H = h.shape
    Hp = w1_p.shape[1]
    Op = w2_p.shape[1]
    assert w1_p.shape[0] == H and w2_p.shape[0] == Hp

    orig_dtype = h.dtype
    if out_dtype is None:
        out_dtype = orig_dtype

    # Match the activation dtype to the (possibly pre-cast bf16) weights so
    # the MXU sees one dtype and h's HBM bytes are halved in bf16 mode.
    # (Ideally the producer of `h` already emits bf16 and this is a no-op.)
    if h.dtype != w1_p.dtype:
        h = h.astype(w1_p.dtype)

    # Batch tile: multiple of 8 (f32 sublane), capped so the grid has >= 2
    # "parallel" steps (both TensorCores busy on v7x).  The partial last tile
    # is masked by Pallas, so no batch padding / output slicing is needed.
    TB = max(8, min(_round_up(tb, 8), _round_up(pl.cdiv(B, 2), 8)))
    grid = (pl.cdiv(B, TB),)

    def _nbytes(x):
        return x.size * x.dtype.itemsize

    cost = pl.CostEstimate(
        flops=2 * B * (H * Hp + Hp * Op),
        transcendentals=0,
        bytes_accessed=(_nbytes(h) + _nbytes(w1_p) + _nbytes(b1_p)
                        + _nbytes(w2_p) + _nbytes(b2_p)
                        + B * Op * jnp.dtype(out_dtype).itemsize),
    )

    # Rough VMEM footprint: resident weights/biases (1x or 2x buffered),
    # double-buffered (h, out) tiles, plus f32 temporaries.
    wb = 1 if single_buffer_weights else 2
    w_item = jnp.dtype(w1_p.dtype).itemsize
    vmem_bytes = (wb * ((H * Hp + Hp * Op) * w_item + (Hp + Op) * 4)
                  + 2 * TB * H * jnp.dtype(h.dtype).itemsize
                  + 2 * TB * Op * jnp.dtype(out_dtype).itemsize
                  + 2 * TB * max(Hp, Op) * 4)
    cp_kwargs = dict(dimension_semantics=("parallel",))
    if vmem_bytes > (30 << 20):
        # Only needed at production shapes; lower `tb` if this exceeds the
        # physical VMEM of the target chip (64 MiB on v7x).
        cp_kwargs["vmem_limit_bytes"] = _round_up(vmem_bytes + (4 << 20),
                                                  1 << 20)

    def _build(single_buf):
        w_kwargs = {"pipeline_mode": pl.Buffered(1)} if single_buf else {}
        return pl.pallas_call(
            feature_predictor_kernel,
            out_shape=jax.ShapeDtypeStruct((B, Op), out_dtype),
            grid=grid,
            in_specs=[
                pl.BlockSpec((TB, H), lambda i: (i, 0)),               # h
                pl.BlockSpec((H, Hp), lambda i: (0, 0), **w_kwargs),   # w1
                pl.BlockSpec((1, Hp), lambda i: (0, 0), **w_kwargs),   # b1
                pl.BlockSpec((Hp, Op), lambda i: (0, 0), **w_kwargs),  # w2
                pl.BlockSpec((1, Op), lambda i: (0, 0), **w_kwargs),   # b2
            ],
            out_specs=pl.BlockSpec((TB, Op), lambda i: (i, 0)),
            compiler_params=pltpu.CompilerParams(**cp_kwargs),
            cost_estimate=cost,
        )

    try:
        out = _build(single_buffer_weights)(h, w1_p, b1_p, w2_p, b2_p)
    except Exception:
        # Fallback if pl.Buffered(1) is rejected by this jax/Mosaic version.
        if not single_buffer_weights:
            raise
        out = _build(False)(h, w1_p, b1_p, w2_p, b2_p)

    if out_features is not None and out_features != Op:
        out = out[:, :out_features]
    return out


def _reference(h, w1, b1, w2, b2):
    z1 = h @ w1 + b1
    a1 = jnp.where(z1 >= 0, z1, 0.01 * z1)
    return a1 @ w2 + b2


if __name__ == "__main__":
    # Small deterministic setup: args.rnn_dim -> hidden=32,
    # args.feature_size -> 128, batch=10 (exercises the masked edge tile).
    B, H, O = 10, 32, 128
    key = jax.random.PRNGKey(0)
    k_h, k_w1, k_b1, k_w2, k_b2, k_h2 = jax.random.split(key, 6)

    h = jax.random.normal(k_h, (B, H), dtype=jnp.float32)

    # PyTorch-like uniform(-1/sqrt(fan_in), 1/sqrt(fan_in)) init,
    # stored as (in_features, out_features).
    bound = 1.0 / jnp.sqrt(jnp.float32(H))
    w1 = jax.random.uniform(k_w1, (H, H), jnp.float32, -bound, bound)
    b1 = jax.random.uniform(k_b1, (H,), jnp.float32, -bound, bound)
    w2 = jax.random.uniform(k_w2, (H, O), jnp.float32, -bound, bound)
    b2 = jax.random.uniform(k_b2, (O,), jnp.float32, -bound, bound)

    ref = _reference(h, w1, b1, w2, b2)

    # f32 path (params padded once, outside the per-call path).
    params_f32 = prepare_feature_predictor_params(w1, b1, w2, b2)
    out = jax.block_until_ready(
        feature_predictor(h, *params_f32, out_features=O))
    assert out.shape == (B, O), out.shape
    assert jnp.allclose(out, ref, atol=1e-5, rtol=1e-5), "f32 mismatch"

    # Larger batch: multi-step grid + masked partial last tile.
    B2 = 1000
    h2 = jax.random.normal(k_h2, (B2, H), dtype=jnp.float32)
    out2 = jax.block_until_ready(
        feature_predictor(h2, *params_f32, out_features=O, tb=1024))
    ref2 = _reference(h2, w1, b1, w2, b2)
    assert out2.shape == (B2, O), out2.shape
    assert jnp.allclose(out2, ref2, atol=1e-4, rtol=1e-4), "tiled mismatch"

    # bf16 MXU fast path (pre-cast weights, f32 epilogue), loose tolerance.
    params_bf16 = prepare_feature_predictor_params(w1, b1, w2, b2,
                                                   use_bf16=True)
    out_bf16 = jax.block_until_ready(
        feature_predictor(h, *params_bf16, out_features=O))
    assert out_bf16.shape == (B, O), out_bf16.shape
    assert jnp.allclose(out_bf16, ref, atol=5e-2, rtol=5e-2), "bf16 mismatch"

    print("KERNEL_OK")
</pallas_src>

<mosaic_0001>
module attributes {stable_mosaic.version = 11 : i64} {
  func.func @feature_predictor_kernel(%arg0: i32, %arg1: memref<8x32xf32, #tpu.memory_space<vmem>>, %arg2: memref<32x128xf32, #tpu.memory_space<vmem>>, %arg3: memref<1x128xf32, #tpu.memory_space<vmem>>, %arg4: memref<128x128xf32, #tpu.memory_space<vmem>>, %arg5: memref<1x128xf32, #tpu.memory_space<vmem>>, %arg6: memref<8x128xf32, #tpu.memory_space<vmem>>) attributes {dimension_semantics = [#tpu.dimension_semantics<parallel>], iteration_bounds = array<i64: 2>, scalar_prefetch = 0 : i64, scratch_operands = 0 : i64, tpu.core_type = #tpu.core_type<tc>, window_params = [{transform_indices = @transform_0, window_bounds = array<i64: 8, 32>}, {pipeline_mode = #tpu.pipeline_mode<synchronous>, transform_indices = @transform_1, window_bounds = array<i64: 32, 128>}, {pipeline_mode = #tpu.pipeline_mode<synchronous>, transform_indices = @transform_2, window_bounds = array<i64: 1, 128>}, {pipeline_mode = #tpu.pipeline_mode<synchronous>, transform_indices = @transform_3, window_bounds = array<i64: 128, 128>}, {pipeline_mode = #tpu.pipeline_mode<synchronous>, transform_indices = @transform_4, window_bounds = array<i64: 1, 128>}, {transform_indices = @transform_5, window_bounds = array<i64: 8, 128>}]} {
    %c0 = arith.constant 0 : index
    %c0_0 = arith.constant 0 : index
    %0 = vector.load %arg1[%c0, %c0_0] : memref<8x32xf32, #tpu.memory_space<vmem>>, vector<8x32xf32>
    %c0_1 = arith.constant 0 : index
    %c0_2 = arith.constant 0 : index
    %1 = vector.load %arg2[%c0_1, %c0_2] : memref<32x128xf32, #tpu.memory_space<vmem>>, vector<32x128xf32>
    %cst = arith.constant dense<0.000000e+00> : vector<8x128xf32>
    %2 = tpu.matmul %0, %1, %cst {dimension_numbers = #tpu.dot_dimension_numbers<[1], [0], [0], [1], [0, 0, 1, 1], [], []>} : vector<8x32xf32>, vector<32x128xf32>, vector<8x128xf32> -> vector<8x128xf32>
    %c0_3 = arith.constant 0 : index
    %c0_4 = arith.constant 0 : index
    %3 = vector.load %arg3[%c0_3, %c0_4] : memref<1x128xf32, #tpu.memory_space<vmem>>, vector<1x128xf32>
    %4 = vector.broadcast %3 : vector<1x128xf32> to vector<8x128xf32>
    %5 = arith.addf %2, %4 : vector<8x128xf32>
    %cst_5 = arith.constant 0.000000e+00 : f32
    %6 = vector.broadcast %cst_5 : f32 to vector<8x128xf32>
    %7 = arith.cmpf oge, %5, %6 : vector<8x128xf32>
    %cst_6 = arith.constant 0.00999999977 : f32
    %8 = vector.broadcast %cst_6 : f32 to vector<8x128xf32>
    %9 = arith.mulf %8, %5 : vector<8x128xf32>
    %10 = arith.select %7, %5, %9 : vector<8x128xi1>, vector<8x128xf32>
    %c0_7 = arith.constant 0 : index
    %c0_8 = arith.constant 0 : index
    %11 = vector.load %arg4[%c0_7, %c0_8] : memref<128x128xf32, #tpu.memory_space<vmem>>, vector<128x128xf32>
    %cst_9 = arith.constant dense<0.000000e+00> : vector<8x128xf32>
    %12 = tpu.matmul %10, %11, %cst_9 {dimension_numbers = #tpu.dot_dimension_numbers<[1], [0], [0], [1], [0, 0, 1, 1], [], []>} : vector<8x128xf32>, vector<128x128xf32>, vector<8x128xf32> -> vector<8x128xf32>
    %c0_10 = arith.constant 0 : index
    %c0_11 = arith.constant 0 : index
    %13 = vector.load %arg5[%c0_10, %c0_11] : memref<1x128xf32, #tpu.memory_space<vmem>>, vector<1x128xf32>
    %14 = vector.broadcast %13 : vector<1x128xf32> to vector<8x128xf32>
    %15 = arith.addf %12, %14 : vector<8x128xf32>
    %c0_12 = arith.constant 0 : index
    %c0_13 = arith.constant 0 : index
    %16 = vector.load %arg6[%c0_12, %c0_13] : memref<8x128xf32, #tpu.memory_space<vmem>>, vector<8x128xf32>
    tpu.vector_store %arg6[%c0_12, %c0_13], %15 {strides = array<i32>} : memref<8x128xf32, #tpu.memory_space<vmem>>, vector<8x128xf32>,
    return
  }
  func.func @transform_0(%arg0: i32) -> (i32, i32) {
    %c0_i32 = arith.constant 0 : i32
    %c0_i32_0 = arith.constant 0 : i32
    return %arg0, %c0_i32 : i32, i32
  }
  func.func @transform_1(%arg0: i32) -> (i32, i32) {
    %c0_i32 = arith.constant 0 : i32
    %c0_i32_0 = arith.constant 0 : i32
    %c0_i32_1 = arith.constant 0 : i32
    return %c0_i32, %c0_i32_0 : i32, i32
  }
  func.func @transform_2(%arg0: i32) -> (i32, i32) {
    %c0_i32 = arith.constant 0 : i32
    %c0_i32_0 = arith.constant 0 : i32
    %c0_i32_1 = arith.constant 0 : i32
    return %c0_i32, %c0_i32_0 : i32, i32
  }
  func.func @transform_3(%arg0: i32) -> (i32, i32) {
    %c0_i32 = arith.constant 0 : i32
    %c0_i32_0 = arith.constant 0 : i32
    %c0_i32_1 = arith.constant 0 : i32
    return %c0_i32, %c0_i32_0 : i32, i32
  }
  func.func @transform_4(%arg0: i32) -> (i32, i32) {
    %c0_i32 = arith.constant 0 : i32
    %c0_i32_0 = arith.constant 0 : i32
    %c0_i32_1 = arith.constant 0 : i32
    return %c0_i32, %c0_i32_0 : i32, i32
  }
  func.func @transform_5(%arg0: i32) -> (i32, i32) {
    %c0_i32 = arith.constant 0 : i32
    %c0_i32_0 = arith.constant 0 : i32
    return %arg0, %c0_i32 : i32, i32
  }
}

module attributes {stable_mosaic.version = 11 : i64} {
  func.func @feature_predictor_kernel(%arg0: i32, %arg1: memref<8x32xf32, #tpu.memory_space<vmem>>, %arg2: memref<32x128xf32, #tpu.memory_space<vmem>>, %arg3: memref<1x128xf32, #tpu.memory_space<vmem>>, %arg4: memref<128x128xf32, #tpu.memory_space<vmem>>, %arg5: memref<1x128xf32, #tpu.memory_space<vmem>>, %arg6: memref<8x128xf32, #tpu.memory_space<vmem>>) attributes {dimension_semantics = [#tpu.dimension_semantics<parallel>], iteration_bounds = array<i64: 2>, scalar_prefetch = 0 : i64, scratch_operands = 0 : i64, tpu.core_type = #tpu.core_type<tc>, window_params = [{transform_indices = @transform_0, window_bounds = array<i64: 8, 32>}, {pipeline_mode = #tpu.pipeline_mode<synchronous>, transform_indices = @transform_1, window_bounds = array<i64: 32, 128>}, {pipeline_mode = #tpu.pipeline_mode<synchronous>, transform_indices = @transform_2, window_bounds = array<i64: 1, 128>}, {pipeline_mode = #tpu.pipeline_mode<synchronous>, transform_indices = @transform_3, window_bounds = array<i64: 128, 128>}, {pipeline_mode = #tpu.pipeline_mode<synchronous>, transform_indices = @transform_4, window_bounds = array<i64: 1, 128>}, {transform_indices = @transform_5, window_bounds = array<i64: 8, 128>}]} {
    %c0 = arith.constant 0 : index
    %c0_0 = arith.constant 0 : index
    %0 = vector.load %arg1[%c0, %c0_0] : memref<8x32xf32, #tpu.memory_space<vmem>>, vector<8x32xf32>
    %c0_1 = arith.constant 0 : index
    %c0_2 = arith.constant 0 : index
    %1 = vector.load %arg2[%c0_1, %c0_2] : memref<32x128xf32, #tpu.memory_space<vmem>>, vector<32x128xf32>
    %cst = arith.constant dense<0.000000e+00> : vector<8x128xf32>
    %2 = tpu.matmul %0, %1, %cst {dimension_numbers = #tpu.dot_dimension_numbers<[1], [0], [0], [1], [0, 0, 1, 1], [], []>} : vector<8x32xf32>, vector<32x128xf32>, vector<8x128xf32> -> vector<8x128xf32>
    %c0_3 = arith.constant 0 : index
    %c0_4 = arith.constant 0 : index
    %3 = vector.load %arg3[%c0_3, %c0_4] : memref<1x128xf32, #tpu.memory_space<vmem>>, vector<1x128xf32>
    %4 = vector.broadcast %3 : vector<1x128xf32> to vector<8x128xf32>
    %5 = arith.addf %2, %4 : vector<8x128xf32>
    %cst_5 = arith.constant 0.000000e+00 : f32
    %6 = vector.broadcast %cst_5 : f32 to vector<8x128xf32>
    %7 = arith.cmpf oge, %5, %6 : vector<8x128xf32>
    %cst_6 = arith.constant 0.00999999977 : f32
    %8 = vector.broadcast %cst_6 : f32 to vector<8x128xf32>
    %9 = arith.mulf %8, %5 : vector<8x128xf32>
    %10 = arith.select %7, %5, %9 : vector<8x128xi1>, vector<8x128xf32>
    %c0_7 = arith.constant 0 : index
    %c0_8 = arith.constant 0 : index
    %11 = vector.load %arg4[%c0_7, %c0_8] : memref<128x128xf32, #tpu.memory_space<vmem>>, vector<128x128xf32>
    %cst_9 = arith.constant dense<0.000000e+00> : vector<8x128xf32>
    %12 = tpu.matmul %10, %11, %cst_9 {dimension_numbers = #tpu.dot_dimension_numbers<[1], [0], [0], [1], [0, 0, 1, 1], [], []>} : vector<8x128xf32>, vector<128x128xf32>, vector<8x128xf32> -> vector<8x128xf32>
    %c0_10 = arith.constant 0 : index
    %c0_11 = arith.constant 0 : index
    %13 = vector.load %arg5[%c0_10, %c0_11] : memref<1x128xf32, #tpu.memory_space<vmem>>, vector<1x128xf32>
    %14 = vector.broadcast %13 : vector<1x128xf32> to vector<8x128xf32>
    %15 = arith.addf %12, %14 : vector<8x128xf32>
    %c0_12 = arith.constant 0 : index
    %c0_13 = arith.constant 0 : index
    %16 = vector.load %arg6[%c0_12, %c0_13] : memref<8x128xf32, #tpu.memory_space<vmem>>, vector<8x128xf32>
    tpu.vector_store %arg6[%c0_12, %c0_13], %15 {strides = array<i32>} : memref<8x128xf32, #tpu.memory_space<vmem>>, vector<8x128xf32>,
    return
  }
  func.func @transform_0(%arg0: i32) -> (i32, i32) {
    %c0_i32 = arith.constant 0 : i32
    %c0_i32_0 = arith.constant 0 : i32
    return %arg0, %c0_i32 : i32, i32
  }
  func.func @transform_1(%arg0: i32) -> (i32, i32) {
    %c0_i32 = arith.constant 0 : i32
    %c0_i32_0 = arith.constant 0 : i32
    %c0_i32_1 = arith.constant 0 : i32
    return %c0_i32, %c0_i32_0 : i32, i32
  }
  func.func @transform_2(%arg0: i32) -> (i32, i32) {
    %c0_i32 = arith.constant 0 : i32
    %c0_i32_0 = arith.constant 0 : i32
    %c0_i32_1 = arith.constant 0 : i32
    return %c0_i32, %c0_i32_0 : i32, i32
  }
  func.func @transform_3(%arg0: i32) -> (i32, i32) {
    %c0_i32 = arith.constant 0 : i32
    %c0_i32_0 = arith.constant 0 : i32
    %c0_i32_1 = arith.constant 0 : i32
    return %c0_i32, %c0_i32_0 : i32, i32
  }
  func.func @transform_4(%arg0: i32) -> (i32, i32) {
    %c0_i32 = arith.constant 0 : i32
    %c0_i32_0 = arith.constant 0 : i32
    %c0_i32_1 = arith.constant 0 : i32
    return %c0_i32, %c0_i32_0 : i32, i32
  }
  func.func @transform_5(%arg0: i32) -> (i32, i32) {
    %c0_i32 = arith.constant 0 : i32
    %c0_i32_0 = arith.constant 0 : i32
    return %arg0, %c0_i32 : i32, i32
  }
}

</mosaic_0001>

<bundles_post_ra>
// kernel: tpu_custom_call.1
= control target key start
LH: loop header
LB: loop body
LE: loop exit
PB: predicated region body
PF: predicated region fallthrough
CT: control target
= control target key end

     0   :  { %10 = vsyncpa [#allocation3], 0  ;;  %s1183_s0 = inlined_call_operand.hbm [shape: f32[10,32], index: 0, kind: input, shape index: {}]   ;;  %s1184_s1 = inlined_call_operand.hbm [shape: f32[32,128], index: 1, kind: input, shape index: {}]   ;;  %s1185_s2 = inlined_call_operand.vmem [shape: f32[1,128], index: 2, kind: input, shape index: {}]   ;;  %s1186_s3 = inlined_call_operand.hbm [shape: f32[128,128], index: 3, kind: input, shape index: {}]   ;;  %s1187_s4 = inlined_call_operand.vmem [shape: f32[1,128], index: 4, kind: input, shape index: {}]   ;;  %s1188_s5 = inlined_call_operand.hbm [shape: f32[10,128], index: 5, kind: output, shape index: {}]  }
   0x1   :  { %12 = vsyncpa [#allocation3 + $0x1], 0 }
   0x2   :  { %13 = vsyncpa [#allocation6], 0 }
   0x3   :  { %14 = vsyncpa [#allocation4], 0 }
   0x4   :  { %16 = vsyncpa [#allocation4 + $0x1], 0  ;;  %s941_s18 = smov 0   ;;  %s943_s19 = smov 0  }
   0x5   :  { %s945_s20 = smov 0   ;;  %s947_s21 = smov 0  }
   0x6 LB: > { %s962_s22 = sadd.s32 4294967295, %s900_s21   ;;  %s555_s23 = sadd.s32 4294967294, %s900_s21   ;;  %s900_s21 = sphi %s947_s21, %s1208_s21   ;;  %s896_s20 = sphi %s945_s20, %s1207_s20   ;;  %s892_s19 = sphi %s943_s19, %s1206_s19   ;;  %s888_s18 = sphi %s941_s18, %s1205_s18  }
   0x7   : > { %p42_p0 = scmp.ne.s32.totalorder %s892_s19, %s888_s18  ;;  %p1189_p1 = scmp.eq.s32.totalorder %s962_s22, 0 }
   0x8   : > { %p156_p3 = scmp.eq.s32.totalorder %s555_s23, 1  ;;  %p556_p5 = scmp.ge.s32.totalorder %s900_s21, 1 }
   0x9   : > { %p971_p4 = por %p1189_p1, %p42_p0  ;;  %p163_p7 = scmp.lt.s32.totalorder %s900_s21, 3 }
   0xa   : > { %p976_p6 = por %p156_p3, %p42_p0  ;;  %s902_s27 = smov [#allocation5]  }
   0xb   : > { %s1192_s24 = scalar_select %p971_p4, 1, 0 }
   0xc   : > { %s1193_s25 = scalar_select %p976_p6, 1, 0 }
   0xd   : > { %p981_p8 = pnand %p556_p5, %p163_p7  ;;  %s175_s28 = sshll.u32 %s902_s27, 4  ;;  %s985_s28 = int_to_ptr.vmem [resolvable:$true] %s175_s28 }
   0xe   : > { %s903_s30 = smov [#allocation7]   ;;  %s744_s9 = scalar_lea.hbm %s1184_s1, 512 }
   0xf   : > { %p684_p9 = pneg %p981_p8  ;;  %s191_s6 = sshll.u32 %s903_s30, 4  ;;  %s996_s6 = int_to_ptr.vmem [resolvable:$true] %s191_s6 }
  0x10   : > { %p745_p12 = scmp.ne.s32.totalorder %s1184_s1, %s744_s9  ;;  %p751_p5 = scmp.lt.u32.totalorder %s744_s9, %s1184_s1 }
  0x11   : > { %p992_p11 = pnand %p684_p9, %p1189_p1 }
  0x13   : > { %p746_p13 = pneg %p992_p11 }
  0x15   : > { %p747_p0 = pnand %p746_p13, %p745_p12 }
  0x17   : > { %p748_p3 = pneg %p747_p0 }
  0x19   : > { %p753_p7 = pnand %p751_p5, %p748_p3 }
  0x1b   : > { %756 = shalt.err (!%p753_p7)
}
  0x1c   : > { %s757_s14 = scalar_lea.vmem %s985_s28, 512  ;;  %p765_p2 = scmp.lt.s32.totalorder %s985_s28, %s985_s28 }
  0x1d   : > { %p758_p9 = scmp.ne.s32.totalorder %s985_s28, %s757_s14  ;;  %p766_p12 = scmp.lt.s32.totalorder %s757_s14, %s757_s14 }
  0x1f   : > { %p760_p10 = pnand %p758_p9, %p746_p13  ;;  %p767_p0 = por %p766_p12, %p765_p2 }
  0x21   : > { %p761_p1 = pneg %p760_p10 }
  0x23   : > { %p768_p6 = pnand %p767_p0, %p761_p1 }
  0x25   : > { %771 = shalt.err (!%p768_p6)
}
  0x26   : > { %s904_s15 = smov 128   ;;  %s905_s16 = smov 8  }
  0x27   : > { %687 = dma.hbm_to_vmem [thread:$0]  (!%p992_p11), %s1184_s1, 512, %s985_s28, [#allocation6], %s904_s15, %s904_s15, %s905_s16  }
  0x28   : > { %s772_s7 = scalar_lea.hbm %s1186_s3, 2048 }
  0x29   : > { %p773_p2 = scmp.ne.s32.totalorder %s1186_s3, %s772_s7  ;;  %p779_p10 = scmp.lt.u32.totalorder %s772_s7, %s1186_s3 }
  0x2b   : > { %p775_p1 = pnand %p773_p2, %p746_p13 }
  0x2d   : > { %p776_p6 = pneg %p775_p1 }
  0x2f   : > { %p781_p3 = pnand %p779_p10, %p776_p6 }
  0x31   : > { %784 = shalt.err (!%p781_p3)
}
  0x32   : > { %s785_s28 = scalar_lea.vmem %s996_s6, 2048  ;;  %p793_p12 = scmp.lt.s32.totalorder %s996_s6, %s996_s6 }
  0x33   : > { %p786_p5 = scmp.ne.s32.totalorder %s996_s6, %s785_s28  ;;  %p794_p0 = scmp.lt.s32.totalorder %s785_s28, %s785_s28 }
  0x35   : > { %p788_p7 = pnand %p786_p5, %p746_p13  ;;  %p795_p2 = por %p794_p0, %p793_p12 }
  0x37   : > { %p789_p9 = pneg %p788_p7 }
  0x39   : > { %p796_p1 = pnand %p795_p2, %p789_p9 }
  0x3b   : > { %799 = shalt.err (!%p796_p1)
}
  0x3c   : > { %690 = dma.hbm_to_vmem [thread:$0]  (!%p992_p11), %s1186_s3, 2048, %s996_s6, [#allocation6], %s904_s15, %s904_s15, %s905_s16  }
  0x3d   : > { %s1051_s14 = sadd.s32 1, %s900_s21   ;;  %s29_s29 = sadd.s32 1, %s896_s20 }
  0x3e   : > { %s26_s17 = ssub.s32 %s900_s21, %s1051_s14  ;;  %p36_p13 = scmp.ne.s32.totalorder %s896_s20, %s892_s19 }
  0x3f   : > { %p27_p6 = scmp.eq.s32.totalorder %s26_s17, 0  ;;  %p37_p10 = scmp.eq.s32.totalorder %s900_s21, 0 }
  0x40   : > { %p1196_p3 = scmp.eq.s32.totalorder %s962_s22, 1  ;;  %p701_p7 = scmp.lt.s32.totalorder %s900_s21, 2 }
  0x41   : > { %s1067_s27 = scalar_select %p27_p6, %s896_s20, %s29_s29  }
  0x42   : > { %p1061_p5 = por %p1196_p3, %p36_p13  ;;  %p38_p9 = por %p37_p10, %p36_p13 }
  0x43   : > { %s208_s30 = sand.u32 1, %s896_s20   ;;  %s561_s6 = sshll.u32 %s900_s21, 7 }
  0x44   : > { %s1197_s23 = scalar_select %p1061_p5, 1, 0 }
  0x45   : > { %s560_s7 = sshll.u32 %s208_s30, 3  ;;  %s1074_s8 = scalar_lea.hbm %s1183_s0, %s561_s6 }
  0x46   : > { %s212_s9 = scalar_lea.vmem [#allocation2], %s560_s7  ;;  %p1078_p11 = pnand %p701_p7, %p38_p9 }
  0x47   : > { %s219_s10 = sshll.u32 %s212_s9, 4  ;;  %s209_s28 = scalar_lea.sflag [#allocation3], %s208_s30  ;;  %s1076_s10 = int_to_ptr.vmem [resolvable:$true] %s219_s10 }
  0x48   : > { %s800_s12 = scalar_lea.hbm %s1074_s8, 128  ;;  %p802_p0 = pneg %p1078_p11 }
  0x49   : > { %p801_p12 = scmp.ne.s32.totalorder %s1074_s8, %s800_s12  ;;  %s805_s17 = scalar_lea.hbm %s1183_s0, 256 }
  0x4a   : > { %p806_p13 = scmp.lt.u32.totalorder %s1074_s8, %s1183_s0  ;;  %p807_p6 = scmp.lt.u32.totalorder %s805_s17, %s800_s12 }
  0x4b   : > { %p803_p2 = pnand %p802_p0, %p801_p12  ;;  %p809_p3 = scmp.lt.u32.totalorder %s800_s12, %s1074_s8 }
  0x4c   : > { %p808_p10 = por %p807_p6, %p806_p13 }
  0x4d   : > { %p804_p1 = pneg %p803_p2 }
  0x4e   : > { %p810_p7 = por %p809_p3, %p808_p10 }
  0x50   : > { %p811_p9 = pnand %p810_p7, %p804_p1 }
  0x52   : > { %814 = shalt.err (!%p811_p9)
}
  0x53   : > { %s815_s30 = scalar_lea.vmem %s1076_s10, 128  ;;  %s906_s15 = smov [#allocation2]  }
  0x54   : > { %p816_p12 = scmp.ne.s32.totalorder %s1076_s10, %s815_s30  ;;  %s820_s16 = sshll.u32 %s906_s15, 4  ;;  %s821_s16 = int_to_ptr.vmem [resolvable:$false] %s820_s16 }
  0x55   : > { %s822_s9 = scalar_lea.vmem %s821_s16, 256  ;;  %p823_p4 = scmp.lt.s32.totalorder %s1076_s10, %s821_s16 }
  0x56   : > { %p818_p2 = pnand %p816_p12, %p802_p0  ;;  %p824_p13 = scmp.lt.s32.totalorder %s822_s9, %s815_s30 }
  0x58   : > { %p819_p5 = pneg %p818_p2  ;;  %p825_p6 = por %p824_p13, %p823_p4 }
  0x5a   : > { %p826_p10 = pnand %p825_p6, %p819_p5 }
  0x5c   : > { %829 = shalt.err (!%p826_p10)
}
  0x5d   : > { %694 = dma.hbm_to_vmem [thread:$0]  (!%p1078_p11), %s1074_s8, 128, %s1076_s10, %s209_s28  }
  0x5e   : > { %228 = sbr.rel (%p981_p8) target bundleno = 560 (0x230), region = 40  ;;  %s1110_s12 = sand.u32 (!%p981_p8), 1, %s892_s19  }
  0x5f   : > { %s563_s13 = sshll.u32 (!%p981_p8), %s1110_s12, 3  ;;  %s231_s29 = scalar_lea.sflag (!%p981_p8), [#allocation3], %s1110_s12 }
  0x60   : > { %s1116_s17 = scalar_lea.vmem (!%p981_p8), [#allocation2], %s563_s13  ;;  %p1199_p4 = scmp.ne.s32.totalorder (!%p981_p8), %s1192_s24, 0 }
  0x65   : > { %875 = dma.done.wait (%p1199_p4), %s231_s29, 128  }
  0x66   : > { %877 = vsyncadd (%p1199_p4), %s231_s29, 4294967168  ;;  %p1200_p5 = scmp.eq.s32.totalorder %s962_s22, 0 }
  0x68   : > { %879 = dma.done.wait (%p1200_p5), [#allocation6], 2560   ;;  %p1201_p8 = pmov %p1200_p5 }
  0x69   : > { %v907_v0 = vmov 0.0|0.0   ;;  %vm908_vm0 = vmmov 0   ;;  %v909_v1 = vmov 0.0   ;;  %v270_v2 = vld [vmem:[#allocation5] sm:$0xff]  ;;  %v271_v3 = vld [vmem:[#allocation5 + $0x8] sm:$0xff]  ;;  %v272_v4 = vld [vmem:[#allocation5 + $0x10] sm:$0xff] }
  0x6a   : > { %881 = vsyncadd (%p1201_p8), [#allocation6], 4294964736  ;;  %642 = vmatprep.subr.bf16.mxu0 %v907_v0  ;;  %604 = vmatprep.mubr.msk.f32.mxu0 %vm908_vm0, %v909_v1  ;;  %v643_v5 = vpack.c.bf16 %v271_v3, %v270_v2  ;;  %v273_v6 = vld [vmem:[#allocation5 + $0x18] sm:$0xff]  ;;  %v358_v7 = vld [vmem:[#allocation7] sm:$0xff]  ;;  %vm281_vm1 = vcmask 261120   ;;  %s571_s11 = sshll.u32 %s962_s22, 7 }
  0x6b   : > { %648 = vmatprep.subr.bf16.mxu1 %v907_v0  ;;  %639 = vmatprep.mubr.msk.f32.mxu1 %vm908_vm0, %v909_v1  ;;  %v359_v8 = vld [vmem:[#allocation7 + $0x8] sm:$0xff]  ;;  %v360_v9 = vld [vmem:[#allocation7 + $0x10] sm:$0xff]  ;;  %v361_v10 = vld [vmem:[#allocation7 + $0x18] sm:$0xff]  ;;  %v646_v11 = vpack.c.bf16 %v273_v6, %v272_v4  ;;  %s268_s28 = scalar_lea.vmem [#allocation8], %s563_s13  ;;  %s1139_s15 = scalar_lea.hbm %s1188_s5, %s571_s11 }
  0x6c   : > { %644 = vmatpush3.bf16.msra.mxu0 %v643_v5  ;;  %v649_v12 = vpack.c.bf16 %v359_v8, %v358_v7  ;;  %v652_v13 = vpack.c.bf16 %v361_v10, %v360_v9  ;;  %v362_v14 = vld [vmem:[#allocation7 + $0x20] sm:$0xff]  ;;  %v363_v15 = vld [vmem:[#allocation7 + $0x28] sm:$0xff]  ;;  %v269_v16 = vld [vmem:[%s1116_s17] sm:$0xff]  ;;  %s466_s7 = sshll.u32 %s268_s28, 4  ;;  %s453_s16 = scalar_lea.sflag [#allocation4], %s1110_s12  ;;  %s1141_s7 = int_to_ptr.vmem [resolvable:$true] %s466_s7 }
  0x6d   : > { %645 = vmatprep.subr.bf16.mxu0 %v907_v0  ;;  %v655_v17 = vpack.c.bf16 %v363_v15, %v362_v14  ;;  %v364_v18 = vld [vmem:[#allocation7 + $0x30] sm:$0xff]  ;;  %v365_v19 = vld [vmem:[#allocation7 + $0x38] sm:$0xff]  ;;  %v366_v21 = vld [vmem:[#allocation7 + $0x40] sm:$0xff]  ;;  %s830_s9 = scalar_lea.vmem %s1141_s7, 128  ;;  %p1202_p0 = scmp.ne.s32.totalorder %s1197_s23, 0 }
  0x6e   : > { %650 = vmatpush3.bf16.msra.mxu1 %v649_v12  ;;  %v658_v20 = vpack.c.bf16 %v365_v19, %v364_v18  ;;  %v367_v22 = vld [vmem:[#allocation7 + $0x48] sm:$0xff]  ;;  %v368_v24 = vld [vmem:[#allocation7 + $0x50] sm:$0xff]  ;;  %v369_v25 = vld [vmem:[#allocation7 + $0x58] sm:$0xff]  ;;  %p831_p11 = scmp.ne.s32.totalorder %s1141_s7, %s830_s9  ;;  %s910_s22 = smov [#allocation8]  }
  0x6f   : > { %651 = vmatprep.subr.bf16.mxu1 %v907_v0  ;;  %v661_v23 = vpack.c.bf16 %v367_v22, %v366_v21  ;;  %v664_v26 = vpack.c.bf16 %v369_v25, %v368_v24  ;;  %v370_v27 = vld [vmem:[#allocation7 + $0x60] sm:$0xff]  ;;  %v371_v28 = vld [vmem:[#allocation7 + $0x68] sm:$0xff]  ;;  %v372_v30 = vld [vmem:[#allocation7 + $0x70] sm:$0xff]  ;;  %s834_s13 = sshll.u32 %s910_s22, 4  ;;  %s835_s13 = int_to_ptr.vmem [resolvable:$false] %s834_s13 }
  0x70   : > { %647 = vmatpush3.bf16.msra.mxu0 %v646_v11  ;;  %v667_v29 = vpack.c.bf16 %v371_v28, %v370_v27  ;;  %v373_v31 = vld [vmem:[#allocation7 + $0x78] sm:$0xff]  ;;  %v567_v33 = vld [vmem:[%s1185_s2] ss:$0 sm:$0xff]  ;;  %p832_p1 = pnand %p831_p11, %p1202_p0  ;;  %s836_s29 = scalar_lea.vmem %s835_s13, 256 }
  0x71   : > { %v670_v32 = vpack.c.bf16 %v373_v31, %v372_v30  ;;  %v569_v39 = vld [vmem:[%s1187_s4] ss:$0 sm:$0xff]  ;;  %p837_p7 = scmp.lt.s32.totalorder %s1141_s7, %s835_s13  ;;  %p838_p9 = scmp.lt.s32.totalorder %s836_s29, %s830_s9 }
  0x72   : > { %653 = vmatpush3.bf16.msra.mxu1 %v652_v13  ;;  %p833_p3 = pneg %p832_p1 }
  0x73   : > { %605 = vmatmul.mubr.msk.f32.vlgmr.msra.gmra.mrb[0].mxu0 %vm281_vm1, %v269_v16  ;;  %654 = vmatprep.subr.bf16.mxu1 %v907_v0  ;;  %p839_p12 = por %p838_p9, %p837_p7 }
  0x75   : > { %p840_p2 = pnand %p839_p12, %p833_p3 }
  0x76   : > { %656 = vmatpush3.bf16.msra.mxu1 %v655_v17 }
  0x77   : > { %657 = vmatprep.subr.bf16.mxu1 %v907_v0 }
  0x7a   : > { %659 = vmatpush3.bf16.msra.mxu1 %v658_v20 }
  0x7b   : > { %660 = vmatprep.subr.bf16.mxu1 %v907_v0 }
  0x7e   : > { %662 = vmatpush3.bf16.msra.mxu1 %v661_v23 }
  0x7f   : > { %663 = vmatprep.subr.bf16.mxu1 %v907_v0 }
  0x82   : > { %665 = vmatpush3.bf16.msra.mxu1 %v664_v26 }
  0x83   : > { %666 = vmatprep.subr.bf16.mxu1 %v907_v0 }
  0x86   : > { %668 = vmatpush3.bf16.msra.mxu1 %v667_v29 }
  0x87   : > { %669 = vmatprep.subr.bf16.mxu1 %v907_v0 }
  0x8a   : > { %671 = vmatpush3.bf16.msra.mxu1 %v670_v32 }
 0x146   : > { %v351_v34 = vpop.f32.mrb[0].mxu0 }
 0x147   : > { %v352_v35 = vadd.f32 %v567_v33, %v351_v34  ;;  %v606_v36 = vpop.f32.mrb[1].mxu0 }
 0x149   : > { %v356_v37 = vmul.f32 0.01, %v352_v35  ;;  %vm355_vm2 = vcmp.ge.f32.partialorder %v352_v35, 0.0 }
 0x14b   : > { %v357_v38 = vsel %vm355_vm2, %v352_v35, %v356_v37 }
 0x14c   : > { %640 = vmatmul.mubr.f32.vlgmr.msra.gmra.mrb[0].mxu1 %v357_v38 }
 0x21f   : > { %v447_v40 = vpop.f32.mrb[0].mxu1 }
 0x220   : > { %v448_v41 = vadd.f32 %v569_v39, %v447_v40  ;;  %v641_v42 = vpop.f32.mrb[1].mxu1 }
 0x222   : > { %451 = vst [vmem:[%s268_s28] sm:$0xff] %v448_v41 }
 0x223   : > { %843 = shalt.err (!%p840_p2)
}
 0x224   : > { %s844_s12 = scalar_lea.hbm %s1139_s15, 128  ;;  %s848_s26 = scalar_lea.hbm %s1188_s5, 256 }
 0x225   : > { %p845_p13 = scmp.ne.s32.totalorder %s1139_s15, %s844_s12  ;;  %p849_p4 = scmp.lt.u32.totalorder %s1139_s15, %s1188_s5 }
 0x226   : > { %p850_p5 = scmp.lt.u32.totalorder %s848_s26, %s844_s12  ;;  %p852_p11 = scmp.lt.u32.totalorder %s844_s12, %s1139_s15 }
 0x227   : > { %p846_p6 = pnand %p845_p13, %p1202_p0 }
 0x228   : > { %p851_p8 = por %p850_p5, %p849_p4 }
 0x229   : > { %p847_p10 = pneg %p846_p6 }
 0x22a   : > { %p853_p1 = por %p852_p11, %p851_p8 }
 0x22c   : > { %p854_p3 = pnand %p853_p1, %p847_p10 }
 0x22e   : > { %857 = shalt.err (!%p854_p3)
}
 0x22f   : > { %682 = dma.vmem_to_hbm [thread:$0]  (%p1202_p0), %s1141_s7, 128, %s1139_s15, %s453_s16  }
 0x230 PF: > { %s478_s11 = sand.u32 1, %s888_s18   ;;  %p1203_p7 = scmp.ne.s32.totalorder %s1193_s25, 0 }
 0x231   : > { %p1204_p9 = scmp.ge.s32.totalorder %s900_s21, 2  ;;  %s479_s28 = scalar_lea.sflag [#allocation4], %s478_s11 }
 0x233   : > { %p696_p12 = pnand %p1204_p9, %p1203_p7 }
 0x235   : > { %883 = dma.done.wait (!%p696_p12), %s479_s28, 128  }
 0x236   : > { %885 = vsyncadd (!%p696_p12), %s479_s28, 4294967168  ;;  %p19_p2 = scmp.ge.s32.totalorder %s1051_s14, 4   ;;  %s1205_s18 = smov %s892_s19 }
 0x237   : > { %s1206_s19 = smov %s896_s20  ;;  %s1207_s20 = smov %s1067_s27 }
 0x238   : > { %s1208_s21 = smov %s1051_s14  ;;  %21 = sbr.rel (!%p19_p2) target bundleno = 6 (0x6), region = 93 }
 0x23f   :  { %484 = vsyncpa [#allocation3], 1 }
 0x240   :  { %486 = vsyncpa [#allocation3 + $0x1], 1 }
 0x241   :  { %487 = vsyncpa [#allocation6], 1 }
 0x242   :  { %488 = vsyncpa [#allocation4], 1 }
 0x243   :  { %490 = vsyncpa [#allocation4 + $0x1], 1 }

// kernel: tpu_custom_call.1
= control target key start
LH: loop header
LB: loop body
LE: loop exit
PB: predicated region body
PF: predicated region fallthrough
CT: control target
= control target key end

     0   :  { %10 = vsyncpa [#allocation3], 0  ;;  %s1183_s0 = inlined_call_operand.hbm [shape: f32[10,32], index: 0, kind: input, shape index: {}]   ;;  %s1184_s1 = inlined_call_operand.hbm [shape: f32[32,128], index: 1, kind: input, shape index: {}]   ;;  %s1185_s2 = inlined_call_operand.vmem [shape: f32[1,128], index: 2, kind: input, shape index: {}]   ;;  %s1186_s3 = inlined_call_operand.hbm [shape: f32[128,128], index: 3, kind: input, shape index: {}]   ;;  %s1187_s4 = inlined_call_operand.vmem [shape: f32[1,128], index: 4, kind: input, shape index: {}]   ;;  %s1188_s5 = inlined_call_operand.hbm [shape: f32[10,128], index: 5, kind: output, shape index: {}]  }
   0x1   :  { %12 = vsyncpa [#allocation3 + $0x1], 0 }
   0x2   :  { %13 = vsyncpa [#allocation6], 0 }
   0x3   :  { %14 = vsyncpa [#allocation4], 0 }
   0x4   :  { %16 = vsyncpa [#allocation4 + $0x1], 0  ;;  %s941_s18 = smov 0   ;;  %s943_s19 = smov 0  }
   0x5   :  { %s945_s20 = smov 0   ;;  %s947_s21 = smov 0  }
   0x6 LB: > { %s962_s22 = sadd.s32 4294967295, %s900_s21   ;;  %s555_s23 = sadd.s32 4294967294, %s900_s21   ;;  %s900_s21 = sphi %s947_s21, %s1208_s21   ;;  %s896_s20 = sphi %s945_s20, %s1207_s20   ;;  %s892_s19 = sphi %s943_s19, %s1206_s19   ;;  %s888_s18 = sphi %s941_s18, %s1205_s18  }
   0x7   : > { %p42_p0 = scmp.ne.s32.totalorder %s892_s19, %s888_s18  ;;  %p1189_p1 = scmp.eq.s32.totalorder %s962_s22, 0 }
   0x8   : > { %p156_p3 = scmp.eq.s32.totalorder %s555_s23, 1  ;;  %p556_p5 = scmp.ge.s32.totalorder %s900_s21, 1 }
   0x9   : > { %p971_p4 = por %p1189_p1, %p42_p0  ;;  %p163_p7 = scmp.lt.s32.totalorder %s900_s21, 3 }
   0xa   : > { %p976_p6 = por %p156_p3, %p42_p0  ;;  %s902_s27 = smov [#allocation5]  }
   0xb   : > { %s1192_s24 = scalar_select %p971_p4, 1, 0 }
   0xc   : > { %s1193_s25 = scalar_select %p976_p6, 1, 0 }
   0xd   : > { %p981_p8 = pnand %p556_p5, %p163_p7  ;;  %s175_s28 = sshll.u32 %s902_s27, 4  ;;  %s985_s28 = int_to_ptr.vmem [resolvable:$true] %s175_s28 }
   0xe   : > { %s903_s30 = smov [#allocation7]   ;;  %s744_s9 = scalar_lea.hbm %s1184_s1, 512 }
   0xf   : > { %p684_p9 = pneg %p981_p8  ;;  %s191_s6 = sshll.u32 %s903_s30, 4  ;;  %s996_s6 = int_to_ptr.vmem [resolvable:$true] %s191_s6 }
  0x10   : > { %p745_p12 = scmp.ne.s32.totalorder %s1184_s1, %s744_s9  ;;  %p751_p5 = scmp.lt.u32.totalorder %s744_s9, %s1184_s1 }
  0x11   : > { %p992_p11 = pnand %p684_p9, %p1189_p1 }
  0x13   : > { %p746_p13 = pneg %p992_p11 }
  0x15   : > { %p747_p0 = pnand %p746_p13, %p745_p12 }
  0x17   : > { %p748_p3 = pneg %p747_p0 }
  0x19   : > { %p753_p7 = pnand %p751_p5, %p748_p3 }
  0x1b   : > { %756 = shalt.err (!%p753_p7)
}
  0x1c   : > { %s757_s14 = scalar_lea.vmem %s985_s28, 512  ;;  %p765_p2 = scmp.lt.s32.totalorder %s985_s28, %s985_s28 }
  0x1d   : > { %p758_p9 = scmp.ne.s32.totalorder %s985_s28, %s757_s14  ;;  %p766_p12 = scmp.lt.s32.totalorder %s757_s14, %s757_s14 }
  0x1f   : > { %p760_p10 = pnand %p758_p9, %p746_p13  ;;  %p767_p0 = por %p766_p12, %p765_p2 }
  0x21   : > { %p761_p1 = pneg %p760_p10 }
  0x23   : > { %p768_p6 = pnand %p767_p0, %p761_p1 }
  0x25   : > { %771 = shalt.err (!%p768_p6)
}
  0x26   : > { %s904_s15 = smov 128   ;;  %s905_s16 = smov 8  }
  0x27   : > { %687 = dma.hbm_to_vmem [thread:$0]  (!%p992_p11), %s1184_s1, 512, %s985_s28, [#allocation6], %s904_s15, %s904_s15, %s905_s16  }
  0x28   : > { %s772_s7 = scalar_lea.hbm %s1186_s3, 2048 }
  0x29   : > { %p773_p2 = scmp.ne.s32.totalorder %s1186_s3, %s772_s7  ;;  %p779_p10 = scmp.lt.u32.totalorder %s772_s7, %s1186_s3 }
  0x2b   : > { %p775_p1 = pnand %p773_p2, %p746_p13 }
  0x2d   : > { %p776_p6 = pneg %p775_p1 }
  0x2f   : > { %p781_p3 = pnand %p779_p10, %p776_p6 }
  0x31   : > { %784 = shalt.err (!%p781_p3)
}
  0x32   : > { %s785_s28 = scalar_lea.vmem %s996_s6, 2048  ;;  %p793_p12 = scmp.lt.s32.totalorder %s996_s6, %s996_s6 }
  0x33   : > { %p786_p5 = scmp.ne.s32.totalorder %s996_s6, %s785_s28  ;;  %p794_p0 = scmp.lt.s32.totalorder %s785_s28, %s785_s28 }
  0x35   : > { %p788_p7 = pnand %p786_p5, %p746_p13  ;;  %p795_p2 = por %p794_p0, %p793_p12 }
  0x37   : > { %p789_p9 = pneg %p788_p7 }
  0x39   : > { %p796_p1 = pnand %p795_p2, %p789_p9 }
  0x3b   : > { %799 = shalt.err (!%p796_p1)
}
  0x3c   : > { %690 = dma.hbm_to_vmem [thread:$0]  (!%p992_p11), %s1186_s3, 2048, %s996_s6, [#allocation6], %s904_s15, %s904_s15, %s905_s16  }
  0x3d   : > { %s1051_s14 = sadd.s32 1, %s900_s21   ;;  %s29_s29 = sadd.s32 1, %s896_s20 }
  0x3e   : > { %s26_s17 = ssub.s32 %s900_s21, %s1051_s14  ;;  %p36_p13 = scmp.ne.s32.totalorder %s896_s20, %s892_s19 }
  0x3f   : > { %p27_p6 = scmp.eq.s32.totalorder %s26_s17, 0  ;;  %p37_p10 = scmp.eq.s32.totalorder %s900_s21, 0 }
  0x40   : > { %p1196_p3 = scmp.eq.s32.totalorder %s962_s22, 1  ;;  %p701_p7 = scmp.lt.s32.totalorder %s900_s21, 2 }
  0x41   : > { %s1067_s27 = scalar_select %p27_p6, %s896_s20, %s29_s29  }
  0x42   : > { %p1061_p5 = por %p1196_p3, %p36_p13  ;;  %p38_p9 = por %p37_p10, %p36_p13 }
  0x43   : > { %s208_s30 = sand.u32 1, %s896_s20   ;;  %s561_s6 = sshll.u32 %s900_s21, 7 }
  0x44   : > { %s1197_s23 = scalar_select %p1061_p5, 1, 0 }
  0x45   : > { %s560_s7 = sshll.u32 %s208_s30, 3  ;;  %s1074_s8 = scalar_lea.hbm %s1183_s0, %s561_s6 }
  0x46   : > { %s212_s9 = scalar_lea.vmem [#allocation2], %s560_s7  ;;  %p1078_p11 = pnand %p701_p7, %p38_p9 }
  0x47   : > { %s219_s10 = sshll.u32 %s212_s9, 4  ;;  %s209_s28 = scalar_lea.sflag [#allocation3], %s208_s30  ;;  %s1076_s10 = int_to_ptr.vmem [resolvable:$true] %s219_s10 }
  0x48   : > { %s800_s12 = scalar_lea.hbm %s1074_s8, 128  ;;  %p802_p0 = pneg %p1078_p11 }
  0x49   : > { %p801_p12 = scmp.ne.s32.totalorder %s1074_s8, %s800_s12  ;;  %s805_s17 = scalar_lea.hbm %s1183_s0, 256 }
  0x4a   : > { %p806_p13 = scmp.lt.u32.totalorder %s1074_s8, %s1183_s0  ;;  %p807_p6 = scmp.lt.u32.totalorder %s805_s17, %s800_s12 }
  0x4b   : > { %p803_p2 = pnand %p802_p0, %p801_p12  ;;  %p809_p3 = scmp.lt.u32.totalorder %s800_s12, %s1074_s8 }
  0x4c   : > { %p808_p10 = por %p807_p6, %p806_p13 }
  0x4d   : > { %p804_p1 = pneg %p803_p2 }
  0x4e   : > { %p810_p7 = por %p809_p3, %p808_p10 }
  0x50   : > { %p811_p9 = pnand %p810_p7, %p804_p1 }
  0x52   : > { %814 = shalt.err (!%p811_p9)
}
  0x53   : > { %s815_s30 = scalar_lea.vmem %s1076_s10, 128  ;;  %s906_s15 = smov [#allocation2]  }
  0x54   : > { %p816_p12 = scmp.ne.s32.totalorder %s1076_s10, %s815_s30  ;;  %s820_s16 = sshll.u32 %s906_s15, 4  ;;  %s821_s16 = int_to_ptr.vmem [resolvable:$false] %s820_s16 }
  0x55   : > { %s822_s9 = scalar_lea.vmem %s821_s16, 256  ;;  %p823_p4 = scmp.lt.s32.totalorder %s1076_s10, %s821_s16 }
  0x56   : > { %p818_p2 = pnand %p816_p12, %p802_p0  ;;  %p824_p13 = scmp.lt.s32.totalorder %s822_s9, %s815_s30 }
  0x58   : > { %p819_p5 = pneg %p818_p2  ;;  %p825_p6 = por %p824_p13, %p823_p4 }
  0x5a   : > { %p826_p10 = pnand %p825_p6, %p819_p5 }
  0x5c   : > { %829 = shalt.err (!%p826_p10)
}
  0x5d   : > { %694 = dma.hbm_to_vmem [thread:$0]  (!%p1078_p11), %s1074_s8, 128, %s1076_s10, %s209_s28  }
  0x5e   : > { %228 = sbr.rel (%p981_p8) target bundleno = 560 (0x230), region = 40  ;;  %s1110_s12 = sand.u32 (!%p981_p8), 1, %s892_s19  }
  0x5f   : > { %s563_s13 = sshll.u32 (!%p981_p8), %s1110_s12, 3  ;;  %s231_s29 = scalar_lea.sflag (!%p981_p8), [#allocation3], %s1110_s12 }
  0x60   : > { %s1116_s17 = scalar_lea.vmem (!%p981_p8), [#allocation2], %s563_s13  ;;  %p1199_p4 = scmp.ne.s32.totalorder (!%p981_p8), %s1192_s24, 0 }
  0x65   : > { %875 = dma.done.wait (%p1199_p4), %s231_s29, 128  }
  0x66   : > { %877 = vsyncadd (%p1199_p4), %s231_s29, 4294967168  ;;  %p1200_p5 = scmp.eq.s32.totalorder %s962_s22, 0 }
  0x68   : > { %879 = dma.done.wait (%p1200_p5), [#allocation6], 2560   ;;  %p1201_p8 = pmov %p1200_p5 }
  0x69   : > { %v907_v0 = vmov 0.0|0.0   ;;  %vm908_vm0 = vmmov 0   ;;  %v909_v1 = vmov 0.0   ;;  %v270_v2 = vld [vmem:[#allocation5] sm:$0xff]  ;;  %v271_v3 = vld [vmem:[#allocation5 + $0x8] sm:$0xff]  ;;  %v272_v4 = vld [vmem:[#allocation5 + $0x10] sm:$0xff] }
  0x6a   : > { %881 = vsyncadd (%p1201_p8), [#allocation6], 4294964736  ;;  %642 = vmatprep.subr.bf16.mxu0 %v907_v0  ;;  %604 = vmatprep.mubr.msk.f32.mxu0 %vm908_vm0, %v909_v1  ;;  %v643_v5 = vpack.c.bf16 %v271_v3, %v270_v2  ;;  %v273_v6 = vld [vmem:[#allocation5 + $0x18] sm:$0xff]  ;;  %v358_v7 = vld [vmem:[#allocation7] sm:$0xff]  ;;  %vm281_vm1 = vcmask 261120   ;;  %s571_s11 = sshll.u32 %s962_s22, 7 }
  0x6b   : > { %648 = vmatprep.subr.bf16.mxu1 %v907_v0  ;;  %639 = vmatprep.mubr.msk.f32.mxu1 %vm908_vm0, %v909_v1  ;;  %v359_v8 = vld [vmem:[#allocation7 + $0x8] sm:$0xff]  ;;  %v360_v9 = vld [vmem:[#allocation7 + $0x10] sm:$0xff]  ;;  %v361_v10 = vld [vmem:[#allocation7 + $0x18] sm:$0xff]  ;;  %v646_v11 = vpack.c.bf16 %v273_v6, %v272_v4  ;;  %s268_s28 = scalar_lea.vmem [#allocation8], %s563_s13  ;;  %s1139_s15 = scalar_lea.hbm %s1188_s5, %s571_s11 }
  0x6c   : > { %644 = vmatpush3.bf16.msra.mxu0 %v643_v5  ;;  %v649_v12 = vpack.c.bf16 %v359_v8, %v358_v7  ;;  %v652_v13 = vpack.c.bf16 %v361_v10, %v360_v9  ;;  %v362_v14 = vld [vmem:[#allocation7 + $0x20] sm:$0xff]  ;;  %v363_v15 = vld [vmem:[#allocation7 + $0x28] sm:$0xff]  ;;  %v269_v16 = vld [vmem:[%s1116_s17] sm:$0xff]  ;;  %s466_s7 = sshll.u32 %s268_s28, 4  ;;  %s453_s16 = scalar_lea.sflag [#allocation4], %s1110_s12  ;;  %s1141_s7 = int_to_ptr.vmem [resolvable:$true] %s466_s7 }
  0x6d   : > { %645 = vmatprep.subr.bf16.mxu0 %v907_v0  ;;  %v655_v17 = vpack.c.bf16 %v363_v15, %v362_v14  ;;  %v364_v18 = vld [vmem:[#allocation7 + $0x30] sm:$0xff]  ;;  %v365_v19 = vld [vmem:[#allocation7 + $0x38] sm:$0xff]  ;;  %v366_v21 = vld [vmem:[#allocation7 + $0x40] sm:$0xff]  ;;  %s830_s9 = scalar_lea.vmem %s1141_s7, 128  ;;  %p1202_p0 = scmp.ne.s32.totalorder %s1197_s23, 0 }
  0x6e   : > { %650 = vmatpush3.bf16.msra.mxu1 %v649_v12  ;;  %v658_v20 = vpack.c.bf16 %v365_v19, %v364_v18  ;;  %v367_v22 = vld [vmem:[#allocation7 + $0x48] sm:$0xff]  ;;  %v368_v24 = vld [vmem:[#allocation7 + $0x50] sm:$0xff]  ;;  %v369_v25 = vld [vmem:[#allocation7 + $0x58] sm:$0xff]  ;;  %p831_p11 = scmp.ne.s32.totalorder %s1141_s7, %s830_s9  ;;  %s910_s22 = smov [#allocation8]  }
  0x6f   : > { %651 = vmatprep.subr.bf16.mxu1 %v907_v0  ;;  %v661_v23 = vpack.c.bf16 %v367_v22, %v366_v21  ;;  %v664_v26 = vpack.c.bf16 %v369_v25, %v368_v24  ;;  %v370_v27 = vld [vmem:[#allocation7 + $0x60] sm:$0xff]  ;;  %v371_v28 = vld [vmem:[#allocation7 + $0x68] sm:$0xff]  ;;  %v372_v30 = vld [vmem:[#allocation7 + $0x70] sm:$0xff]  ;;  %s834_s13 = sshll.u32 %s910_s22, 4  ;;  %s835_s13 = int_to_ptr.vmem [resolvable:$false] %s834_s13 }
  0x70   : > { %647 = vmatpush3.bf16.msra.mxu0 %v646_v11  ;;  %v667_v29 = vpack.c.bf16 %v371_v28, %v370_v27  ;;  %v373_v31 = vld [vmem:[#allocation7 + $0x78] sm:$0xff]  ;;  %v567_v33 = vld [vmem:[%s1185_s2] ss:$0 sm:$0xff]  ;;  %p832_p1 = pnand %p831_p11, %p1202_p0  ;;  %s836_s29 = scalar_lea.vmem %s835_s13, 256 }
  0x71   : > { %v670_v32 = vpack.c.bf16 %v373_v31, %v372_v30  ;;  %v569_v39 = vld [vmem:[%s1187_s4] ss:$0 sm:$0xff]  ;;  %p837_p7 = scmp.lt.s32.totalorder %s1141_s7, %s835_s13  ;;  %p838_p9 = scmp.lt.s32.totalorder %s836_s29, %s830_s9 }
  0x72   : > { %653 = vmatpush3.bf16.msra.mxu1 %v652_v13  ;;  %p833_p3 = pneg %p832_p1 }
  0x73   : > { %605 = vmatmul.mubr.msk.f32.vlgmr.msra.gmra.mrb[0].mxu0 %vm281_vm1, %v269_v16  ;;  %654 = vmatprep.subr.bf16.mxu1 %v907_v0  ;;  %p839_p12 = por %p838_p9, %p837_p7 }
  0x75   : > { %p840_p2 = pnand %p839_p12, %p833_p3 }
  0x76   : > { %656 = vmatpush3.bf16.msra.mxu1 %v655_v17 }
  0x77   : > { %657 = vmatprep.subr.bf16.mxu1 %v907_v0 }
  0x7a   : > { %659 = vmatpush3.bf16.msra.mxu1 %v658_v20 }
  0x7b   : > { %660 = vmatprep.subr.bf16.mxu1 %v907_v0 }
  0x7e   : > { %662 = vmatpush3.bf16.msra.mxu1 %v661_v23 }
  0x7f   : > { %663 = vmatprep.subr.bf16.mxu1 %v907_v0 }
  0x82   : > { %665 = vmatpush3.bf16.msra.mxu1 %v664_v26 }
  0x83   : > { %666 = vmatprep.subr.bf16.mxu1 %v907_v0 }
  0x86   : > { %668 = vmatpush3.bf16.msra.mxu1 %v667_v29 }
  0x87   : > { %669 = vmatprep.subr.bf16.mxu1 %v907_v0 }
  0x8a   : > { %671 = vmatpush3.bf16.msra.mxu1 %v670_v32 }
 0x146   : > { %v351_v34 = vpop.f32.mrb[0].mxu0 }
 0x147   : > { %v352_v35 = vadd.f32 %v567_v33, %v351_v34  ;;  %v606_v36 = vpop.f32.mrb[1].mxu0 }
 0x149   : > { %v356_v37 = vmul.f32 0.01, %v352_v35  ;;  %vm355_vm2 = vcmp.ge.f32.partialorder %v352_v35, 0.0 }
 0x14b   : > { %v357_v38 = vsel %vm355_vm2, %v352_v35, %v356_v37 }
 0x14c   : > { %640 = vmatmul.mubr.f32.vlgmr.msra.gmra.mrb[0].mxu1 %v357_v38 }
 0x21f   : > { %v447_v40 = vpop.f32.mrb[0].mxu1 }
 0x220   : > { %v448_v41 = vadd.f32 %v569_v39, %v447_v40  ;;  %v641_v42 = vpop.f32.mrb[1].mxu1 }
 0x222   : > { %451 = vst [vmem:[%s268_s28] sm:$0xff] %v448_v41 }
 0x223   : > { %843 = shalt.err (!%p840_p2)
}
 0x224   : > { %s844_s12 = scalar_lea.hbm %s1139_s15, 128  ;;  %s848_s26 = scalar_lea.hbm %s1188_s5, 256 }
 0x225   : > { %p845_p13 = scmp.ne.s32.totalorder %s1139_s15, %s844_s12  ;;  %p849_p4 = scmp.lt.u32.totalorder %s1139_s15, %s1188_s5 }
 0x226   : > { %p850_p5 = scmp.lt.u32.totalorder %s848_s26, %s844_s12  ;;  %p852_p11 = scmp.lt.u32.totalorder %s844_s12, %s1139_s15 }
 0x227   : > { %p846_p6 = pnand %p845_p13, %p1202_p0 }
 0x228   : > { %p851_p8 = por %p850_p5, %p849_p4 }
 0x229   : > { %p847_p10 = pneg %p846_p6 }
 0x22a   : > { %p853_p1 = por %p852_p11, %p851_p8 }
 0x22c   : > { %p854_p3 = pnand %p853_p1, %p847_p10 }
 0x22e   : > { %857 = shalt.err (!%p854_p3)
}
 0x22f   : > { %682 = dma.vmem_to_hbm [thread:$0]  (%p1202_p0), %s1141_s7, 128, %s1139_s15, %s453_s16  }
 0x230 PF: > { %s478_s11 = sand.u32 1, %s888_s18   ;;  %p1203_p7 = scmp.ne.s32.totalorder %s1193_s25, 0 }
 0x231   : > { %p1204_p9 = scmp.ge.s32.totalorder %s900_s21, 2  ;;  %s479_s28 = scalar_lea.sflag [#allocation4], %s478_s11 }
 0x233   : > { %p696_p12 = pnand %p1204_p9, %p1203_p7 }
 0x235   : > { %883 = dma.done.wait (!%p696_p12), %s479_s28, 128  }
 0x236   : > { %885 = vsyncadd (!%p696_p12), %s479_s28, 4294967168  ;;  %p19_p2 = scmp.ge.s32.totalorder %s1051_s14, 4   ;;  %s1205_s18 = smov %s892_s19 }
 0x237   : > { %s1206_s19 = smov %s896_s20  ;;  %s1207_s20 = smov %s1067_s27 }
 0x238   : > { %s1208_s21 = smov %s1051_s14  ;;  %21 = sbr.rel (!%p19_p2) target bundleno = 6 (0x6), region = 93 }
 0x23f   :  { %484 = vsyncpa [#allocation3], 1 }
 0x240   :  { %486 = vsyncpa [#allocation3 + $0x1], 1 }
 0x241   :  { %487 = vsyncpa [#allocation6], 1 }
 0x242   :  { %488 = vsyncpa [#allocation4], 1 }
 0x243   :  { %490 = vsyncpa [#allocation4 + $0x1], 1 }

</bundles_post_ra>
